<compile_context>
chip_gen: v7x
topology: tpu7x:2x2x1
jax: 0.10.0
libtpu: 0.0.40
codegen_flags: <defaults>
</compile_context>

<pallas_src>
import jax
import jax.numpy as jnp
from jax import lax
from jax.experimental import pallas as pl
from jax.experimental.pallas import tpu as pltpu


def _mix32(x):
    """murmur3-style 32-bit finalizer; pure VPU integer ops (portable)."""
    x = x ^ (x >> 16)
    x = x * jnp.uint32(0x7FEB352D)
    x = x ^ (x >> 15)
    x = x * jnp.uint32(0x846CA68B)
    x = x ^ (x >> 16)
    return x


def _make_sdpa_kernel(dropout_p: float, scale: float, heads_per_block: int,
                      pv_bf16: bool):
    """softmax(qk*scale, -1) -> dropout(p) -> @ value; loop over heads in-kernel."""
    if not 0.0 <= dropout_p < 1.0:
        raise ValueError("dropout_p must be in [0, 1)")
    keep_scale = 1.0 / (1.0 - dropout_p) if dropout_p > 0.0 else 1.0
    # element is DROPPED iff hashed uint32 bits < drop_threshold (P ~= dropout_p)
    drop_threshold = min(int(dropout_p * float(1 << 32)), (1 << 32) - 1)

    def kernel(seed_ref, qk_ref, v_ref, o_ref):
        # qk_ref block: (1, Hg, S, S); v_ref / o_ref blocks: (1, Hg, S, D).
        S = qk_ref.shape[2]
        b = pl.program_id(0)
        g = pl.program_id(1)
        num_g = pl.num_programs(1)
        seed_u32 = seed_ref[0].astype(jnp.uint32)

        def per_head(h, carry):
            # Per-head temporaries are (S,S) f32 ~16 KB -> live in vregs, no
            # full-(H,S,S) spills to VMEM.
            qk = qk_ref[0, h].astype(jnp.float32)                # (S, S)

            # qk / inv_scale_factor == qk * (1/inv_scale_factor); `scale` is a
            # trace-time Python constant -> one VPU multiply, no divide pass.
            scaled = qk * scale

            # Numerically stable softmax along the last dim (exact divide).
            m = jnp.max(scaled, axis=-1, keepdims=True)
            e = jnp.exp(scaled - m)
            denom = jnp.sum(e, axis=-1, keepdims=True)
            inv = 1.0 / denom                                    # (S, 1)

            if dropout_p > 0.0:
                # Counter-based hash PRNG keyed on (seed, global head, row,
                # col): portable (no pltpu.prng_*), deterministic, and streams
                # never collide across batch elements or sequential seeds.
                # TODO(synk): not bit-compatible with torch's dropout RNG.
                row = lax.broadcasted_iota(jnp.int32, (S, S), 0)
                col = lax.broadcasted_iota(jnp.int32, (S, S), 1)
                head_id = (b * num_g + g) * heads_per_block + h
                idx = (head_id * S + row) * S + col
                x = idx.astype(jnp.uint32) + seed_u32 * jnp.uint32(0x9E3779B9)
                bits = _mix32(x)
                keep = bits >= jnp.uint32(drop_threshold)
                # fold the 1/(1-p) keep-scale into the normalization multiply
                probs = jnp.where(keep, e * (inv * jnp.float32(keep_scale)),
                                  jnp.float32(0.0))
            else:
                probs = e * inv

            v = v_ref[0, h]                                      # (S, D)
            if pv_bf16:
                # Opt-in: native-rate MXU path, f32 accumulation.
                out = jnp.dot(probs.astype(jnp.bfloat16),
                              v.astype(jnp.bfloat16),
                              preferred_element_type=jnp.float32)
            else:
                out = jnp.dot(probs.astype(v.dtype), v,
                              preferred_element_type=jnp.float32)
            o_ref[0, h] = out.astype(o_ref.dtype)
            return carry

        lax.fori_loop(0, heads_per_block, per_head, 0)

    return kernel


def sdpa_dropout_matmul(qk, value, inv_scale_factor, *, dropout_p=0.1, seed=0,
                        pv_bf16=False):
    """output = dropout(softmax(qk / inv_scale_factor, -1), p) @ value."""
    B, H, S, S2 = qk.shape
    assert S == S2, "qk must be (B, H, S, S)"
    Bv, Hv, Sv, D = value.shape
    assert (Bv, Hv, Sv) == (B, H, S), "value must be (B, H, S, D)"

    out_dtype = jnp.promote_types(qk.dtype, value.dtype)
    scale = 1.0 / float(inv_scale_factor)        # trace-time constant
    seed_arr = jnp.asarray([seed], dtype=jnp.int32)

    # Grid: (batch, head-group).  Splitting heads into 2 groups gives an even
    # number of parallel steps per batch element so v7x's two TensorCores
    # balance even when B is odd (e.g. the module's B=5); harmless on v5e/v6e.
    G = 2 if (H % 2 == 0 and H >= 2) else 1
    Hg = H // G

    # NOTE on output layout: D=64 < 128 lanes -> masked stores.  A lane-dense
    # (B, S, H*D) layout would avoid them, but needs an in-kernel cross-lane
    # relayout; output is only ~1/3 of the traffic here, so we keep the
    # natural (B, H, S, D) layout.
    grid_spec = pltpu.PrefetchScalarGridSpec(
        num_scalar_prefetch=1,
        grid=(B, G),
        in_specs=[
            pl.BlockSpec((1, Hg, S, S), lambda b, g, _: (b, g, 0, 0)),
            pl.BlockSpec((1, Hg, S, D), lambda b, g, _: (b, g, 0, 0)),
        ],
        out_specs=pl.BlockSpec((1, Hg, S, D), lambda b, g, _: (b, g, 0, 0)),
    )

    return pl.pallas_call(
        _make_sdpa_kernel(dropout_p, scale, Hg, pv_bf16),
        out_shape=jax.ShapeDtypeStruct((B, H, S, D), out_dtype),
        grid_spec=grid_spec,
        compiler_params=pltpu.CompilerParams(
            dimension_semantics=("parallel", "parallel")),
    )(seed_arr, qk, value)


def _reference_no_dropout(qk, value, inv_scale_factor):
    scaled = qk.astype(jnp.float32) / inv_scale_factor
    probs = jax.nn.softmax(scaled, axis=-1)
    return jnp.einsum("bhqk,bhkd->bhqd", probs, value.astype(jnp.float32),
                      precision=lax.Precision.HIGHEST)


if __name__ == "__main__":
    key = jax.random.PRNGKey(0)
    k1, k2 = jax.random.split(key)

    # Small shapes consistent with the module (original uses qk=(5,10,64,64)).
    B, H, S, D = 2, 4, 64, 64
    qk = jax.random.normal(k1, (B, H, S, S), dtype=jnp.float32)
    value = jax.random.normal(k2, (B, H, S, D), dtype=jnp.float32)
    inv_scale_factor = 8.0  # e.g. sqrt(d_k)

    # Correctness: dropout disabled must match the exact-softmax reference.
    out_nodrop = sdpa_dropout_matmul(qk, value, inv_scale_factor, dropout_p=0.0)
    ref = _reference_no_dropout(qk, value, inv_scale_factor).astype(out_nodrop.dtype)
    assert out_nodrop.shape == (B, H, S, D)
    assert jnp.allclose(out_nodrop, ref, atol=5e-4, rtol=5e-4), (
        "mismatch vs reference: max abs err = "
        f"{jnp.max(jnp.abs(out_nodrop - ref))}")

    # Full forward pass with the module's dropout_p = 0.1.
    out = sdpa_dropout_matmul(qk, value, inv_scale_factor, dropout_p=0.1, seed=0)
    out = jax.block_until_ready(out)
    assert out.shape == (B, H, S, D)
    assert bool(jnp.all(jnp.isfinite(out)))
    print("KERNEL_OK")
</pallas_src>

<mosaic_0001>
module attributes {stable_mosaic.version = 11 : i64} {
  func.func @kernel(%arg0: i32, %arg1: i32, %arg2: memref<1xi32, #tpu.memory_space<smem>>, %arg3: memref<1x2x64x64xf32, #tpu.memory_space<vmem>>, %arg4: memref<1x2x64x64xf32, #tpu.memory_space<vmem>>, %arg5: memref<1x2x64x64xf32, #tpu.memory_space<vmem>>) attributes {dimension_semantics = [#tpu.dimension_semantics<parallel>, #tpu.dimension_semantics<parallel>], iteration_bounds = array<i64: 2, 2>, scalar_prefetch = 1 : i64, scratch_operands = 0 : i64, tpu.core_type = #tpu.core_type<tc>, window_params = [{transform_indices = @transform_0, window_bounds = array<i64: 1, 2, 64, 64>}, {transform_indices = @transform_1, window_bounds = array<i64: 1, 2, 64, 64>}, {transform_indices = @transform_2, window_bounds = array<i64: 1, 2, 64, 64>}]} {
    %c0_i32 = arith.constant 0 : i32
    %c2_i32 = arith.constant 2 : i32
    %0 = arith.addi %c0_i32, %c2_i32 : i32
    %c1_i32 = arith.constant 1 : i32
    scf.for %arg6 = %c0_i32 to %0 step %c1_i32  : i32 {
      %c0 = arith.constant 0 : index
      %1 = arith.index_cast %arg6 : i32 to index
      %c0_1 = arith.constant 0 : index
      %c0_2 = arith.constant 0 : index
      %2 = vector.load %arg3[%c0, %1, %c0_1, %c0_2] : memref<1x2x64x64xf32, #tpu.memory_space<vmem>>, vector<1x1x64x64xf32>
      %3 = vector.shape_cast %2 : vector<1x1x64x64xf32> to vector<64x64xf32>
      %cst = arith.constant 1.250000e-01 : f32
      %4 = vector.broadcast %cst : f32 to vector<64x64xf32>
      %5 = arith.mulf %3, %4 : vector<64x64xf32>
      %cst_3 = arith.constant dense<0xFF800000> : vector<64xf32>
      %6 = vector.multi_reduction <maximumf>, %5, %cst_3 [1] : vector<64x64xf32> to vector<64xf32>
      %7 = vector.shape_cast %6 : vector<64xf32> to vector<64x1xf32>
      %8 = vector.broadcast %7 : vector<64x1xf32> to vector<64x64xf32>
      %9 = arith.subf %5, %8 : vector<64x64xf32>
      %10 = math.exp %9 : vector<64x64xf32>
      %cst_4 = arith.constant dense<0.000000e+00> : vector<64xf32>
      %11 = vector.multi_reduction <add>, %10, %cst_4 [1] : vector<64x64xf32> to vector<64xf32>
      %12 = vector.shape_cast %11 : vector<64xf32> to vector<64x1xf32>
      %cst_5 = arith.constant 1.000000e+00 : f32
      %13 = vector.broadcast %cst_5 : f32 to vector<64x1xf32>
      %14 = arith.divf %13, %12 : vector<64x1xf32>
      %15 = vector.broadcast %14 : vector<64x1xf32> to vector<64x64xf32>
      %16 = arith.mulf %10, %15 : vector<64x64xf32>
      %c0_6 = arith.constant 0 : index
      %17 = arith.index_cast %arg6 : i32 to index
      %c0_7 = arith.constant 0 : index
      %c0_8 = arith.constant 0 : index
      %18 = vector.load %arg4[%c0_6, %17, %c0_7, %c0_8] : memref<1x2x64x64xf32, #tpu.memory_space<vmem>>, vector<1x1x64x64xf32>
      %19 = vector.shape_cast %18 : vector<1x1x64x64xf32> to vector<64x64xf32>
      %cst_9 = arith.constant dense<0.000000e+00> : vector<64x64xf32>
      %20 = tpu.matmul %16, %19, %cst_9 {dimension_numbers = #tpu.dot_dimension_numbers<[1], [0], [0], [1], [0, 0, 1, 1], [], []>} : vector<64x64xf32>, vector<64x64xf32>, vector<64x64xf32> -> vector<64x64xf32>
      %c0_10 = arith.constant 0 : index
      %21 = arith.index_cast %arg6 : i32 to index
      %c0_11 = arith.constant 0 : index
      %c0_12 = arith.constant 0 : index
      %22 = vector.load %arg5[%c0_10, %21, %c0_11, %c0_12] : memref<1x2x64x64xf32, #tpu.memory_space<vmem>>, vector<1x1x64x64xf32>
      %23 = vector.shape_cast %22 : vector<1x1x64x64xf32> to vector<64x64xf32>
      %24 = vector.shape_cast %20 : vector<64x64xf32> to vector<1x1x64x64xf32>
      tpu.vector_store %arg5[%c0_10, %21, %c0_11, %c0_12], %24 {strides = array<i32>} : memref<1x2x64x64xf32, #tpu.memory_space<vmem>>, vector<1x1x64x64xf32>,
    }
    %c2_i32_0 = arith.constant 2 : i32
    return
  }
  func.func @transform_0(%arg0: i32, %arg1: i32, %arg2: memref<1xi32, #tpu.memory_space<smem>>) -> (i32, i32, i32, i32) {
    %c0_i32 = arith.constant 0 : i32
    %c0_i32_0 = arith.constant 0 : i32
    %c0_i32_1 = arith.constant 0 : i32
    return %arg0, %arg1, %c0_i32, %c0_i32_0 : i32, i32, i32, i32
  }
  func.func @transform_1(%arg0: i32, %arg1: i32, %arg2: memref<1xi32, #tpu.memory_space<smem>>) -> (i32, i32, i32, i32) {
    %c0_i32 = arith.constant 0 : i32
    %c0_i32_0 = arith.constant 0 : i32
    %c0_i32_1 = arith.constant 0 : i32
    return %arg0, %arg1, %c0_i32, %c0_i32_0 : i32, i32, i32, i32
  }
  func.func @transform_2(%arg0: i32, %arg1: i32, %arg2: memref<1xi32, #tpu.memory_space<smem>>) -> (i32, i32, i32, i32) {
    %c0_i32 = arith.constant 0 : i32
    %c0_i32_0 = arith.constant 0 : i32
    %c0_i32_1 = arith.constant 0 : i32
    return %arg0, %arg1, %c0_i32, %c0_i32_0 : i32, i32, i32, i32
  }
}

</mosaic_0001>

<bundles_post_ra>
// kernel: tpu_custom_call.1
= control target key start
LH: loop header
LB: loop body
LE: loop exit
PB: predicated region body
PF: predicated region fallthrough
CT: control target
= control target key end

     0   :  { %s1424_s0 = inlined_call_operand.<no memory space> [shape: s32[1], index: 0, kind: input, shape index: {}]   ;;  %s1425_s1 = inlined_call_operand.hbm [shape: f32[2,4,64,64], index: 1, kind: input, shape index: {}]   ;;  %s1426_s2 = inlined_call_operand.hbm [shape: f32[2,4,64,64], index: 2, kind: input, shape index: {}]   ;;  %s1427_s3 = inlined_call_operand.hbm [shape: f32[2,4,64,64], index: 3, kind: output, shape index: {}]  }
   0x1   :  { %1432 = sst [smem:[#allocation14_spill]] %s1425_s1 }
   0x2   :  { %9 = vsyncpa [#allocation5], 0 }
   0x3   :  { %11 = vsyncpa [#allocation5 + $0x1], 0 }
   0x4   :  { %12 = vsyncpa [#allocation8], 0 }
   0x5   :  { %14 = vsyncpa [#allocation8 + $0x1], 0 }
   0x6   :  { %15 = vsyncpa [#allocation6], 0 }
   0x7   :  { %17 = vsyncpa [#allocation6 + $0x1], 0  ;;  %s1074_s12 = smov 0   ;;  %s1076_s13 = smov 0  }
   0x8   :  { %s1078_s0 = smov 0   ;;  %s1080_s14 = smov 0  }
   0x9   :  { %s1082_s15 = smov 0   ;;  %s1084_s16 = smov 0  }
   0xa   :  { %s1086_s17 = smov 0   ;;  %s1088_s18 = smov 0  }
   0xb LB: > { %s643_s19 = sadd.s32 4294967295, %s1041_s18   ;;  %s644_s20 = sadd.s32 4294967294, %s1041_s18   ;;  %s1041_s18 = sphi %s1088_s18, %s23_s18   ;;  %s1037_s17 = sphi %s1086_s17, %s1452_s17   ;;  %s1033_s16 = sphi %s1084_s16, %s1451_s16   ;;  %s1029_s15 = sphi %s1082_s15, %s1450_s15   ;;  %s1025_s14 = sphi %s1080_s14, %s1449_s14   ;;  %s1021_s0 = sphi %s1078_s0, %s1448_s0   ;;  %s1017_s13 = sphi %s1076_s13, %s1447_s13   ;;  %s1013_s12 = sphi %s1074_s12, %s1446_s12  }
   0xc   : > { %s32_s21 = sadd.s32 1, %s1033_s16  ;;  %s35_s22 = sadd.s32 1, %s1037_s17 }
   0xd   : > { %p33_p0 = scmp.ge.s32.totalorder %s32_s21, 2  ;;  %s44_s23 = sadd.s32 1, %s1021_s0 }
   0xe   : > { %p51_p1 = scmp.ne.s32.totalorder %s1021_s0, %s1017_s13  ;;  %p52_p2 = scmp.eq.s32.totalorder %s1041_s18, 0 }
   0xf   : > { %s1454_s21 = smov (%p33_p0, %s32_s21), 0  ;;  %s1456_s22 = smov (!%p33_p0, %s35_s22), %s1037_s17 }
  0x10   : > { %s40_s24 = ssub.s32 %s1033_s16, %s1454_s21  ;;  %p1127_p3 = por %p52_p2, %p51_p1 }
  0x11   : > { %p37_p4 = scmp.ge.s32.totalorder %s1456_s22, 2  ;;  %p57_p5 = scmp.ne.s32.totalorder %s1017_s13, %s1013_s12 }
  0x12   : > { %p58_p6 = scmp.eq.s32.totalorder %s643_s19, 0  ;;  %p111_p7 = scmp.eq.s32.totalorder %s643_s19, 3 }
  0x13   : > { %s1458_s22 = smov (%p37_p4, %s1456_s22), 0  ;;  %p117_p10 = scmp.eq.s32.totalorder %s644_s20, 3 }
  0x14   : > { %1434 = sst [smem:[#allocation13_spill]] %s1458_s22  ;;  %p1135_p8 = por %p58_p6, %p57_p5 }
  0x15   : > { %p1139_p9 = por %p111_p7, %p51_p1  ;;  %s39_s28 = ssub.s32 %s1037_s17, %s1458_s22 }
  0x16   : > { %s1435_s26 = scalar_select %p1135_p8, 1, 0 }
  0x17   : > { %s1436_s27 = scalar_select %p1139_p9, 1, 0 }
  0x18   : > { %s41_s29 = sor.u32 %s40_s24, %s39_s28  ;;  %p1145_p12 = por %p117_p10, %p57_p5 }
  0x19   : > { %p42_p11 = scmp.eq.s32.totalorder %s41_s29, 0  ;;  %p765_p13 = scmp.lt.s32.totalorder %s1041_s18, 4 }
  0x1a   : > { %s1437_s30 = scalar_select %p1145_p12, 1, 0 }
  0x1b   : > { %s1151_s4 = sand.u32 1, %s1021_s0   ;;  %s677_s7 = sshll.u32 %s1033_s16, 4 }
  0x1c   : > { %s1154_s5 = scalar_select %p42_p11, %s1021_s0, %s44_s23  }
  0x1d   : > { %s1428_s6 = sshll.u32 %s1151_s4, 7  ;;  %s650_s8 = sshll.u32 %s1037_s17, 5 }
  0x1e   : > { %s141_s9 = scalar_lea.vmem [#allocation4], %s1428_s6  ;;  %s1161_s11 = sadd.s32 %s677_s7, %s650_s8 }
  0x1f   : > { %s151_s10 = sshll.u32 %s141_s9, 4  ;;  %s651_s19 = sshll.u32 %s1161_s11, 7  ;;  %s1163_s10 = int_to_ptr.vmem [resolvable:$true] %s151_s10 }
  0x20   : > { %p1168_p0 = pnand %p765_p13, %p1127_p3  ;;  %s1439_s1 = sld [smem:[#allocation14_spill]] }
  0x21   : > { %s138_s29 = scalar_lea.sflag [#allocation5], %s1151_s4 }
  0x22   : > { %p877_p2 = pneg %p1168_p0 }
  0x26   : > { %s1177_s28 = scalar_lea.hbm %s1439_s1, %s651_s19  ;;  %s880_s9 = scalar_lea.hbm %s1439_s1, 8192 }
  0x27   : > { %s875_s7 = scalar_lea.hbm %s1177_s28, 2048  ;;  %p881_p5 = scmp.lt.u32.totalorder %s1177_s28, %s1439_s1 }
  0x28   : > { %p876_p1 = scmp.ne.s32.totalorder %s1177_s28, %s875_s7  ;;  %p882_p6 = scmp.lt.u32.totalorder %s880_s9, %s875_s7 }
  0x29   : > { %p884_p10 = scmp.lt.u32.totalorder %s875_s7, %s1177_s28 }
  0x2a   : > { %p878_p3 = pnand %p877_p2, %p876_p1  ;;  %p883_p7 = por %p882_p6, %p881_p5 }
  0x2c   : > { %p879_p4 = pneg %p878_p3  ;;  %p885_p11 = por %p884_p10, %p883_p7 }
  0x2e   : > { %p886_p13 = pnand %p885_p11, %p879_p4 }
  0x30   : > { %889 = shalt.err (!%p886_p13)
}
  0x31   : > { %s890_s6 = scalar_lea.vmem %s1163_s10, 2048  ;;  %s1047_s25 = smov [#allocation4]  }
  0x32   : > { %p891_p1 = scmp.ne.s32.totalorder %s1163_s10, %s890_s6  ;;  %s895_s8 = sshll.u32 %s1047_s25, 4  ;;  %s896_s8 = int_to_ptr.vmem [resolvable:$false] %s895_s8 }
  0x33   : > { %s897_s23 = scalar_lea.vmem %s896_s8, 4096  ;;  %p898_p9 = scmp.lt.s32.totalorder %s1163_s10, %s896_s8 }
  0x34   : > { %p893_p3 = pnand %p891_p1, %p877_p2  ;;  %p899_p5 = scmp.lt.s32.totalorder %s897_s23, %s890_s6 }
  0x36   : > { %p894_p12 = pneg %p893_p3  ;;  %p900_p6 = por %p899_p5, %p898_p9 }
  0x38   : > { %p901_p7 = pnand %p900_p6, %p894_p12 }
  0x3a   : > { %904 = shalt.err (!%p901_p7)
}
  0x3b   : > { %s1048_s7 = smov 128   ;;  %s1049_s9 = smov 8  }
  0x3c   : > { %757 = dma.hbm_to_vmem [thread:$0]  (!%p1168_p0), %s1177_s28, 2048, %s1163_s10, %s138_s29, %s1048_s7, %s1048_s7, %s1049_s9  }
  0x3d   : > { %p657_p9 = scmp.ge.s32.totalorder %s1041_s18, 1  ;;  %p183_p12 = scmp.lt.s32.totalorder %s1041_s18, 5 }
  0x3e   : > { %s1221_s8 = scalar_lea.hbm %s1426_s2, %s651_s19  ;;  %s1441_s23 = sshll.u32 %s1151_s4, 7 }
  0x3f   : > { %p1212_p4 = pnand %p657_p9, %p183_p12  ;;  %s165_s1 = scalar_lea.vmem [#allocation7], %s1441_s23 }
  0x40   : > { %s175_s22 = sshll.u32 %s165_s1, 4  ;;  %s162_s10 = scalar_lea.sflag [#allocation8], %s1151_s4  ;;  %s1225_s22 = int_to_ptr.vmem [resolvable:$true] %s175_s22 }
  0x41   : > { %s905_s28 = scalar_lea.hbm %s1221_s8, 2048  ;;  %s910_s19 = scalar_lea.hbm %s1426_s2, 8192 }
  0x42   : > { %p906_p10 = scmp.ne.s32.totalorder %s1221_s8, %s905_s28  ;;  %p911_p1 = scmp.lt.u32.totalorder %s1221_s8, %s1426_s2 }
  0x43   : > { %p912_p3 = scmp.lt.u32.totalorder %s910_s19, %s905_s28  ;;  %p914_p6 = scmp.lt.u32.totalorder %s905_s28, %s1221_s8 }
  0x44   : > { %p908_p11 = pnand %p906_p10, %p877_p2 }
  0x45   : > { %p913_p5 = por %p912_p3, %p911_p1 }
  0x46   : > { %p909_p13 = pneg %p908_p11 }
  0x47   : > { %p915_p7 = por %p914_p6, %p913_p5 }
  0x49   : > { %p916_p9 = pnand %p915_p7, %p909_p13 }
  0x4b   : > { %919 = shalt.err (!%p916_p9)
}
  0x4c   : > { %s920_s1 = scalar_lea.vmem %s1225_s22, 2048  ;;  %s1050_s23 = smov [#allocation7]  }
  0x4d   : > { %p921_p12 = scmp.ne.s32.totalorder %s1225_s22, %s920_s1  ;;  %s925_s11 = sshll.u32 %s1050_s23, 4  ;;  %s926_s11 = int_to_ptr.vmem [resolvable:$false] %s925_s11 }
  0x4e   : > { %s927_s29 = scalar_lea.vmem %s926_s11, 4096  ;;  %p928_p8 = scmp.lt.s32.totalorder %s1225_s22, %s926_s11 }
  0x4f   : > { %p923_p10 = pnand %p921_p12, %p877_p2  ;;  %p929_p1 = scmp.lt.s32.totalorder %s927_s29, %s920_s1 }
  0x51   : > { %p924_p11 = pneg %p923_p10  ;;  %p930_p3 = por %p929_p1, %p928_p8 }
  0x53   : > { %p931_p5 = pnand %p930_p3, %p924_p11 }
  0x55   : > { %934 = shalt.err (!%p931_p5)
}
  0x56   : > { %760 = dma.hbm_to_vmem [thread:$0]  (!%p1168_p0), %s1221_s8, 2048, %s1225_s22, %s162_s10, %s1048_s7, %s1048_s7, %s1049_s9  }
  0x57   : > { %187 = sbr.rel (%p1212_p4) target bundleno = 661 (0x295), region = 28  ;;  %s1259_s28 = sand.u32 (!%p1212_p4), 1, %s1017_s13  }
  0x58   : > { %s1262_s19 = sshll.u32 (!%p1212_p4), %s1259_s28, 7  ;;  %s190_s20 = scalar_lea.sflag (!%p1212_p4), [#allocation5], %s1259_s28 }
  0x59   : > { %s193_s24 = scalar_lea.vmem (!%p1212_p4), [#allocation4], %s1262_s19  ;;  %p1442_p8 = scmp.ne.s32.totalorder (!%p1212_p4), %s1435_s26, 0 }
  0x5e   : > { %1000 = dma.done.wait (%p1442_p8), %s190_s20, 2048  }
  0x5f   : > { %1002 = vsyncadd (%p1442_p8), %s190_s20, 4294965248  ;;  %s199_s22 = scalar_lea.sflag [#allocation8], %s1259_s28  ;;  %s202_s4 = scalar_lea.vmem [#allocation7], %s1262_s19 }
  0x60   : > { %1004 = dma.done.wait (%p1442_p8), %s199_s22, 2048  }
  0x61   : > { %1006 = vsyncadd (%p1442_p8), %s199_s22, 4294965248  ;;  %s227_s7 = scalar_lea.vmem [#allocation9], %s1262_s19  ;;  %s1277_s9 = smov 0  }
  0x62 LB: >> { %s1283_s6 = sshll.u32 %s1045_s9, 6  ;;  %vm255_vm0 = vcmask 523264   ;;  %s236_s9 = sadd.s32 1, %s1045_s9   ;;  %s1045_s9 = sphi %s1277_s9, %s236_s9  }
  0x63   : >> { %s238_s8 = scalar_lea.vmem %s193_s24, %s1283_s6 [#allocation4]  ;;  %s352_s26 = scalar_lea.vmem %s202_s4, %s1283_s6 [#allocation7] }
  0x64   : >> { %v239_v0 = vld [vmem:[%s238_s8] sm:$0xff]  ;;  %v240_v1 = vld [vmem:[%s238_s8 + $0x8] sm:$0xff]  ;;  %v241_v8 = vld [vmem:[%s238_s8 + $0x10] sm:$0xff]  ;;  %s490_s10 = scalar_lea.vmem %s227_s7, %s1283_s6 [#allocation9]  ;;  %p233_p0 = scmp.ge.s32.totalorder %s236_s9, 2  }
  0x65   : >> { %v243_v2 = vld [vmem:[%s238_s8 + $0x20] sm:$0xff]  ;;  %v247_v3 = vmul.f32 0.125, %v239_v0  ;;  %v248_v4 = vmul.f32 0.125, %v240_v1  ;;  %v244_v6 = vld [vmem:[%s238_s8 + $0x28] sm:$0xff]  ;;  %v245_v9 = vld [vmem:[%s238_s8 + $0x30] sm:$0xff]  ;;  %v249_v14 = vmul.f32 0.125, %v241_v8 }
  0x66   : >> { %v251_v5 = vmul.f32 0.125, %v243_v2  ;;  %v252_v7 = vmul.f32 0.125, %v244_v6  ;;  %v253_v15 = vmul.f32 0.125, %v245_v9  ;;  %v242_v16 = vld [vmem:[%s238_s8 + $0x18] sm:$0xff]  ;;  %v353_v63 = vld [vmem:[%s352_s26] sm:$0xff]  ;;  %v354_v0 = vld [vmem:[%s352_s26 + $0x8] sm:$0xff] }
  0x67   : >> { %v256_v10 = vsel %vm255_vm0, %v247_v3, -inf  ;;  %v259_v11 = vsel %vm255_vm0, %v248_v4, -inf  ;;  %v246_v17 = vld [vmem:[%s238_s8 + $0x38] sm:$0xff]  ;;  %v262_v18 = vsel %vm255_vm0, %v249_v14, -inf  ;;  %v250_v20 = vmul.f32 0.125, %v242_v16  ;;  %v357_v6 = vld [vmem:[%s352_s26 + $0x20] sm:$0xff] }
  0x68   : >> { %257 = vmax.xlane.f32.xlu0 %v256_v10  ;;  %260 = vmax.xlane.f32.xlu1 %v259_v11  ;;  %v268_v12 = vsel %vm255_vm0, %v251_v5, -inf  ;;  %v271_v13 = vsel %vm255_vm0, %v252_v7, -inf  ;;  %v274_v19 = vsel %vm255_vm0, %v253_v15, -inf  ;;  %v254_v21 = vmul.f32 0.125, %v246_v17  ;;  %v359_v9 = vld [vmem:[%s352_s26 + $0x30] sm:$0xff]  ;;  %v360_v10 = vld [vmem:[%s352_s26 + $0x38] sm:$0xff] }
  0x69   : >> { %v265_v22 = vsel %vm255_vm0, %v250_v20, -inf  ;;  %v724_v2 = vpack.c.bf16 %v354_v0, %v353_v63  ;;  %v736_v11 = vpack.c.bf16 %v360_v10, %v359_v9  ;;  %s679_s25 = sshll.u32 (%p233_p0), %s1025_s14, 4  ;;  %s673_s1 = sshll.u32 (%p233_p0), %s1029_s15, 5 }
  0x6a   : >> { %v277_v23 = vsel %vm255_vm0, %v254_v21, -inf  ;;  %s516_s23 = sshll.u32 (%p233_p0), %s227_s7, 4  ;;  %s513_s11 = sadd.s32 (%p233_p0), %s679_s25, %s673_s1  ;;  %s1365_s23 = int_to_ptr.vmem [resolvable:$true] %s516_s23 }
  0x6b   : >> { %725 = vmatprep.subr.bf16.mxu0 %v724_v2  ;;  %740 = vmatprep.subr.bf16.mxu1 %v724_v2  ;;  %s674_s29 = sshll.u32 (%p233_p0), %s513_s11, 7  ;;  %s500_s24 = scalar_lea.sflag (%p233_p0), [#allocation6], %s1259_s28 }
  0x6c   : >> { %269 = vmax.xlane.f32.xlu0 %v268_v12  ;;  %272 = vmax.xlane.f32.xlu1 %v271_v13  ;;  %s1370_s9 = scalar_lea.hbm (%p233_p0), %s1427_s3, %s674_s29  ;;  %s935_s4 = scalar_lea.vmem (%p233_p0), %s1365_s23, 2048 }
  0x6d   : >> { %727 = vmatpush3.bf16.msra.mxu0 %v724_v2  ;;  %744 = vmatpush3.bf16.msra.mxu1 %v724_v2  ;;  %p936_p2 = scmp.ne.s32.totalorder (%p233_p0), %s1365_s23, %s935_s4  ;;  %p1443_p4 = scmp.ne.s32.totalorder (%p233_p0), %s1436_s27, 0 }
  0x6e   : > { %s1051_s14 = smov (%p233_p0), [#allocation9]  }
  0x6f   : > { %p937_p13 = pnand (%p233_p0), %p936_p2, %p1443_p4  ;;  %s939_s15 = sshll.u32 (%p233_p0), %s1051_s14, 4  ;;  %s940_s15 = int_to_ptr.vmem [resolvable:$false] %s939_s15 }
  0x70   : >> { %263 = vmax.xlane.f32.xlu0 %v262_v18  ;;  %275 = vmax.xlane.f32.xlu1 %v274_v19  ;;  %s941_s19 = scalar_lea.vmem (%p233_p0), %s940_s15, 4096  ;;  %p942_p7 = scmp.lt.s32.totalorder (%p233_p0), %s1365_s23, %s940_s15 }
  0x71   : > { %p938_p6 = pneg (%p233_p0), %p937_p13  ;;  %p943_p9 = scmp.lt.s32.totalorder (%p233_p0), %s941_s19, %s935_s4 }
  0x73   : > { %p944_p12 = por (%p233_p0), %p943_p9, %p942_p7 }
  0x74   : >> { %266 = vmax.xlane.f32.xlu0 %v265_v22  ;;  %278 = vmax.xlane.f32.xlu1 %v277_v23 }
  0x75   : > { %p945_p10 = pnand (%p233_p0), %p944_p12, %p938_p6 }
  0xf5   : >> { %v258_v24 = vpop.xlane.xlu0 %257  ;;  %v261_v25 = vpop.xlane.xlu1 %260 }
  0xf6   : >> { %v280_v26 = vsub.f32 %v247_v3, %v258_v24  ;;  %v281_v27 = vsub.f32 %v248_v4, %v261_v25  ;;  %v355_v3 = vld [vmem:[%s352_s26 + $0x10] sm:$0xff]  ;;  %v356_v4 = vld [vmem:[%s352_s26 + $0x18] sm:$0xff] }
  0xf8   : >> { %v288_v28 = vmul.f32 1.442695, %v280_v26  ;;  %v290_v29 = vmul.f32 1.442695, %v281_v27 }
  0xf9   : >> { %v270_v30 = vpop.xlane.xlu0 %269  ;;  %v273_v31 = vpop.xlane.xlu1 %272 }
  0xfa   : >> { %843 = vpow2.f32 %v288_v28  ;;  %v284_v32 = vsub.f32 %v251_v5, %v270_v30  ;;  %v285_v33 = vsub.f32 %v252_v7, %v273_v31  ;;  %v728_v5 = vpack.c.bf16 %v356_v4, %v355_v3  ;;  %v358_v7 = vld [vmem:[%s352_s26 + $0x28] sm:$0xff] }
  0xfb   : >> { %845 = vpow2.f32 %v290_v29  ;;  %v732_v8 = vpack.c.bf16 %v358_v7, %v357_v6 }
  0xfc   : >> { %v296_v34 = vmul.f32 1.442695, %v284_v32  ;;  %v298_v35 = vmul.f32 1.442695, %v285_v33  ;;  %729 = vmatprep.subr.bf16.mxu0 %v728_v5  ;;  %741 = vmatprep.subr.bf16.mxu1 %v728_v5 }
  0xfd   : >> { %v264_v36 = vpop.xlane.xlu0 %263  ;;  %v276_v37 = vpop.xlane.xlu1 %275  ;;  %731 = vmatpush3.bf16.msra.mxu0 %v728_v5  ;;  %745 = vmatpush3.bf16.msra.mxu1 %v728_v5 }
  0xfe   : >> { %847 = vpow2.f32 %v296_v34  ;;  %v282_v38 = vsub.f32 %v249_v14, %v264_v36  ;;  %v286_v39 = vsub.f32 %v253_v15, %v276_v37  ;;  %733 = vmatprep.subr.bf16.mxu0 %v732_v8  ;;  %742 = vmatprep.subr.bf16.mxu1 %v732_v8 }
  0xff   : >> { %849 = vpow2.f32 %v298_v35 }
 0x100   : >> { %v292_v40 = vmul.f32 1.442695, %v282_v38  ;;  %v300_v41 = vmul.f32 1.442695, %v286_v39 }
 0x101   : >> { %v267_v42 = vpop.xlane.xlu0 %266  ;;  %v279_v43 = vpop.xlane.xlu1 %278  ;;  %735 = vmatpush3.bf16.msra.mxu0 %v732_v8  ;;  %746 = vmatpush3.bf16.msra.mxu1 %v732_v8 }
 0x102   : >> { %851 = vpow2.f32 %v292_v40  ;;  %v283_v44 = vsub.f32 %v250_v20, %v267_v42  ;;  %v287_v45 = vsub.f32 %v254_v21, %v279_v43  ;;  %737 = vmatprep.subr.bf16.mxu0 %v736_v11  ;;  %743 = vmatprep.subr.bf16.mxu1 %v736_v11 }
 0x103   : >> { %853 = vpow2.f32 %v300_v41 }
 0x104   : >> { %v1296_v46 = vpop.eup %843  ;;  %v294_v47 = vmul.f32 1.442695, %v283_v44  ;;  %v302_v48 = vmul.f32 1.442695, %v287_v45 }
 0x105   : >> { %v1298_v49 = vpop.eup %845  ;;  %v304_v50 = vsel %vm255_vm0, %v1296_v46, 0.0  ;;  %739 = vmatpush3.bf16.msra.mxu0 %v736_v11  ;;  %747 = vmatpush3.bf16.msra.mxu1 %v736_v11 }
 0x106   : >> { %855 = vpow2.f32 %v294_v47  ;;  %305 = vadd.xlane.f32.xlu0 %v304_v50  ;;  %v307_v51 = vsel %vm255_vm0, %v1298_v49, 0.0 }
 0x107   : >> { %857 = vpow2.f32 %v302_v48 }
 0x108   : >> { %v1304_v52 = vpop.eup %847 }
 0x109   : >> { %v1306_v53 = vpop.eup %849  ;;  %v316_v54 = vsel %vm255_vm0, %v1304_v52, 0.0 }
 0x10a   : >> { %308 = vadd.xlane.f32.xlu0 %v307_v51  ;;  %317 = vadd.xlane.f32.xlu1 %v316_v54  ;;  %v319_v55 = vsel %vm255_vm0, %v1306_v53, 0.0 }
 0x10c   : >> { %v1312_v56 = vpop.eup %851 }
 0x10d   : >> { %v1314_v57 = vpop.eup %853  ;;  %v310_v58 = vsel %vm255_vm0, %v1312_v56, 0.0 }
 0x10e   : >> { %320 = vadd.xlane.f32.xlu1 %v319_v55  ;;  %311 = vadd.xlane.f32.xlu0 %v310_v58  ;;  %v322_v59 = vsel %vm255_vm0, %v1314_v57, 0.0 }
 0x110   : >> { %v1323_v60 = vpop.eup %855 }
 0x111   : >> { %v1325_v61 = vpop.eup %857  ;;  %v313_v62 = vsel %vm255_vm0, %v1323_v60, 0.0 }
 0x112   : >> { %323 = vadd.xlane.f32.xlu1 %v322_v59  ;;  %314 = vadd.xlane.f32.xlu0 %v313_v62  ;;  %v325_v1 = vsel %vm255_vm0, %v1325_v61, 0.0 }
 0x116   : >> { %326 = vadd.xlane.f32.xlu1 %v325_v1 }
 0x193   : >> { %v306_v12 = vpop.xlane.xlu0 %305 }
 0x194   : >> { %859 = vrcp.f32 %v306_v12 }
 0x197   : >> { %v318_v13 = vpop.xlane.xlu1 %317  ;;  %v309_v14 = vpop.xlane.xlu0 %308 }
 0x198   : >> { %861 = vrcp.f32 %v318_v13 }
 0x199   : >> { %863 = vrcp.f32 %v309_v14 }
 0x19b   : >> { %v321_v15 = vpop.xlane.xlu1 %320  ;;  %v312_v16 = vpop.xlane.xlu0 %311 }
 0x19c   : >> { %865 = vrcp.f32 %v321_v15 }
 0x19d   : >> { %867 = vrcp.f32 %v312_v16 }
 0x19e   : >> { %v860_v17 = vpop.eup %859 }
 0x19f   : >> { %v324_v18 = vpop.xlane.xlu1 %323  ;;  %v315_v19 = vpop.xlane.xlu0 %314  ;;  %v344_v20 = vmul.f32 %v860_v17, %v1296_v46 }
 0x1a0   : >> { %869 = vrcp.f32 %v324_v18 }
 0x1a1   : >> { %871 = vrcp.f32 %v315_v19  ;;  %712 = vmatprep.mubr.msk.f32.mxu0 %vm255_vm0, %v344_v20 }
 0x1a2   : >> { %v862_v21 = vpop.eup %861 }
 0x1a3   : >> { %v864_v22 = vpop.eup %863  ;;  %v327_v23 = vpop.xlane.xlu1 %326  ;;  %v348_v24 = vmul.f32 %v862_v21, %v1304_v52 }
 0x1a4   : >> { %873 = vrcp.f32 %v327_v23  ;;  %v345_v25 = vmul.f32 %v864_v22, %v1298_v49 }
 0x1a5   : >> { %718 = vmatprep.mubr.msk.f32.mxu1 %vm255_vm0, %v348_v24 }
 0x1a6   : >> { %v866_v26 = vpop.eup %865  ;;  %713 = vmatmul.mubr.msk.f32.vlgmr.msra.gmra.mrb[0].mxu0 %vm255_vm0, %v345_v25 }
 0x1a7   : >> { %v868_v27 = vpop.eup %867  ;;  %v349_v28 = vmul.f32 %v866_v26, %v1306_v53 }
 0x1a8   : >> { %v346_v29 = vmul.f32 %v868_v27, %v1312_v56 }
 0x1a9   : >> { %719 = vmatmul.mubr.msk.f32.vlgmr.msra.gmra.mrb[0].mxu1 %vm255_vm0, %v349_v28 }
 0x1aa   : >> { %v870_v30 = vpop.eup %869  ;;  %715 = vmatprep.mubr.msk.f32.mxu0 %vm255_vm0, %v346_v29 }
 0x1ab   : >> { %v872_v31 = vpop.eup %871  ;;  %v350_v32 = vmul.f32 %v870_v30, %v1314_v57 }
 0x1ac   : >> { %v347_v33 = vmul.f32 %v872_v31, %v1323_v60 }
 0x1ad   : >> { %721 = vmatprep.mubr.msk.f32.mxu1 %vm255_vm0, %v350_v32 }
 0x1ae   : >> { %v874_v34 = vpop.eup %873  ;;  %716 = vmatmul.mubr.msk.f32.gmra.mrb[2].mxu0 %vm255_vm0, %v347_v33 }
 0x1af   : >> { %v351_v35 = vmul.f32 %v874_v34, %v1325_v61 }
 0x1b1   : >> { %722 = vmatmul.mubr.msk.f32.gmra.mrb[2].mxu1 %vm255_vm0, %v351_v35 }
 0x279   : >> { %v714_v36 = vpop.f32.mrb[0].mxu0 }
 0x27a   : >> { %492 = vst.msk [vmem:[%s490_s10 + $0x8] sm:$0xff] %vm255_vm0, %v714_v36  ;;  %v451_v37 = vpop.f32.mrb[1].mxu0 }
 0x27b   : >> { %491 = vst.msk [vmem:[%s490_s10] sm:$0xff] %vm255_vm0, %v451_v37 }
 0x27c   : >> { %v720_v38 = vpop.f32.mrb[0].mxu1 }
 0x27d   : >> { %496 = vst.msk [vmem:[%s490_s10 + $0x28] sm:$0xff] %vm255_vm0, %v720_v38  ;;  %v471_v39 = vpop.f32.mrb[1].mxu1 }
 0x27e   : >> { %495 = vst.msk [vmem:[%s490_s10 + $0x20] sm:$0xff] %vm255_vm0, %v471_v39 }
 0x280   : > { %235 = sbr.rel (!%p233_p0) target bundleno = 98 (0x62), region = 96 }
 0x281   : >> { %v717_v40 = vpop.f32.mrb[2].mxu0 }
 0x282   : >> { %494 = vst.msk [vmem:[%s490_s10 + $0x18] sm:$0xff] %vm255_vm0, %v717_v40  ;;  %v461_v41 = vpop.f32.mrb[3].mxu0 }
 0x283   : >> { %493 = vst.msk [vmem:[%s490_s10 + $0x10] sm:$0xff] %vm255_vm0, %v461_v41 }
 0x284   : >> { %v723_v42 = vpop.f32.mrb[2].mxu1 }
 0x285   : >> { %498 = vst.msk [vmem:[%s490_s10 + $0x38] sm:$0xff] %vm255_vm0, %v723_v42  ;;  %v481_v43 = vpop.f32.mrb[3].mxu1 }
 0x286   : >> { %497 = vst.msk [vmem:[%s490_s10 + $0x30] sm:$0xff] %vm255_vm0, %v481_v43 }
 0x287   : > { %948 = shalt.err (!%p945_p10)
}
 0x288   : > { %s949_s7 = scalar_lea.hbm %s1370_s9, 2048  ;;  %s953_s26 = scalar_lea.hbm %s1427_s3, 8192 }
 0x289   : > { %p950_p11 = scmp.ne.s32.totalorder %s1370_s9, %s949_s7  ;;  %p954_p5 = scmp.lt.u32.totalorder %s1370_s9, %s1427_s3 }
 0x28a   : > { %p955_p8 = scmp.lt.u32.totalorder %s953_s26, %s949_s7  ;;  %p957_p2 = scmp.lt.u32.totalorder %s949_s7, %s1370_s9 }
 0x28b   : > { %p951_p1 = pnand %p950_p11, %p1443_p4 }
 0x28c   : > { %p956_p0 = por %p955_p8, %p954_p5 }
 0x28d   : > { %p952_p3 = pneg %p951_p1 }
 0x28e   : > { %p958_p13 = por %p957_p2, %p956_p0 }
 0x290   : > { %p959_p6 = pnand %p958_p13, %p952_p3 }
 0x292   : > { %962 = shalt.err (!%p959_p6)
}
 0x293   : > { %s1052_s1 = smov 128   ;;  %s1053_s11 = smov 8  }
 0x294   : > { %752 = dma.vmem_to_hbm [thread:$0]  (%p1443_p4), %s1365_s23, 2048, %s1370_s9, %s500_s24, %s1052_s1, %s1052_s1, %s1053_s11  }
 0x295 PF: > { %p766_p7 = scmp.ge.s32.totalorder %s1041_s18, 2  ;;  %s531_s29 = sand.u32 1, %s1013_s12  }
 0x296   : > { %p1444_p9 = scmp.ne.s32.totalorder %s1437_s30, 0  ;;  %s532_s20 = scalar_lea.sflag [#allocation6], %s531_s29 }
 0x298   : > { %p762_p12 = pnand %p766_p7, %p1444_p9 }
 0x29a   : > { %1008 = dma.done.wait (!%p762_p12), %s532_s20, 2048  }
 0x29b   : > { %1010 = vsyncadd (!%p762_p12), %s532_s20, 4294965248  ;;  %s23_s18 = sadd.s32 1, %s1041_s18   ;;  %s1445_s27 = sld [smem:[#allocation13_spill]] }
 0x29c   : > { %p20_p10 = scmp.ge.s32.totalorder %s23_s18, 6   ;;  %s1446_s12 = smov %s1017_s13 }
 0x29d   : > { %s1447_s13 = smov %s1021_s0  ;;  %s1448_s0 = smov %s1154_s5 }
 0x29e   : > { %s1449_s14 = smov %s1033_s16  ;;  %s1450_s15 = smov %s1037_s17 }
 0x29f   : > { %s1451_s16 = smov %s1454_s21  ;;  %22 = sbr.rel (!%p20_p10) target bundleno = 11 (0xb), region = 107 }
 0x2a1   : > { %s1452_s17 = smov %s1445_s27 }
 0x2a6   :  { %537 = vsyncpa [#allocation5], 1 }
 0x2a7   :  { %539 = vsyncpa [#allocation5 + $0x1], 1 }
 0x2a8   :  { %540 = vsyncpa [#allocation8], 1 }
 0x2a9   :  { %542 = vsyncpa [#allocation8 + $0x1], 1 }
 0x2aa   :  { %543 = vsyncpa [#allocation6], 1 }
 0x2ab   :  { %545 = vsyncpa [#allocation6 + $0x1], 1 }

</bundles_post_ra>
